<compile_context>
chip_gen: v6e
topology: v6e:2x2x1
jax: 0.10.0
libtpu: 0.0.40
codegen_flags: <defaults>
</compile_context>

<pallas_src>
import functools

import jax
import jax.numpy as jnp
from jax.experimental import pallas as pl
from jax.experimental.pallas import tpu as pltpu

LANES = 128
_CHUNK = 256  # inner-loop rows per step; multiple of 32 -> legal for all dtypes


def _huber(diff):
    # Branch-free Smooth-L1 (beta = 1):  q = min(d, 1);  q * (d - 0.5*q)
    #   d <  1 : d*(d - 0.5*d) = 0.5*d^2
    #   d >= 1 : 1*(d - 0.5)   = d - 0.5
    q = jnp.minimum(diff, 1.0)
    return q * (diff - 0.5 * q)


def _make_kernel(tile_rows, chunk_rows, steps, rows_total, first_masked, needs_mask):
    n_chunks = tile_rows // chunk_rows

    def kernel(pred_ref, true_ref, o_ref):
        c = pl.program_id(0)  # per-core partial sum ("parallel")
        i = pl.program_id(1)  # per-core step ("arbitrary")

        @pl.when(i == 0)
        def _():
            o_ref[...] = jnp.zeros_like(o_ref)

        g = c * steps + i  # logical (unclamped) global row-block index

        def _chunk_loss(s):
            r0 = pl.multiple_of(s * chunk_rows, chunk_rows)
            p = pred_ref[pl.ds(r0, chunk_rows), :].astype(jnp.float32)
            t = true_ref[pl.ds(r0, chunk_rows), :].astype(jnp.float32)
            return _huber(jnp.abs(p - t))

        def _accumulate(s, acc, mask):
            loss = _chunk_loss(s)
            if mask:
                row_ids = (g * tile_rows + s * chunk_rows
                           + jax.lax.broadcasted_iota(
                               jnp.int32, (chunk_rows, LANES), 0))
                loss = jnp.where(row_ids < rows_total, loss, 0.0)
            return acc + loss.reshape(chunk_rows // 8, 8, LANES).sum(axis=0)

        zero = jnp.zeros((8, LANES), jnp.float32)

        def _run(mask):
            acc = jax.lax.fori_loop(
                0, n_chunks, functools.partial(_accumulate, mask=mask), zero,
                unroll=True)
            o_ref[...] += acc

        if needs_mask:
            # Only the last real (ragged) block and any phantom block pay for
            # the iota/compare/select; every other block stays on the fast path.
            @pl.when(g < first_masked)
            def _():
                _run(mask=False)

            @pl.when(g >= first_masked)
            def _():
                _run(mask=True)
        else:
            _run(mask=False)

    return kernel


def _pallas_partial_sum(pred2d, true2d, rows, sub, tile_rows):
    """Sum of smooth-L1 loss over a (rows, 128) slab via a Pallas kernel."""
    # Largest legal tile: multiple of sublane granularity, <= rows, capped at
    # tile_rows; once above _CHUNK, a multiple of _CHUNK so chunks tile evenly.
    t = max(sub, min(tile_rows, (rows // sub) * sub))
    if t > _CHUNK:
        t = (t // _CHUNK) * _CHUNK
        chunk = _CHUNK
    else:
        chunk = t

    nb = pl.cdiv(rows, t)                 # number of real row-blocks
    num_cores = 2 if nb >= 2 else 1       # v7x: split across both TensorCores
    steps = pl.cdiv(nb, num_cores)
    total_blocks = num_cores * steps
    first_masked = (nb - 1) if (rows % t) else nb
    needs_mask = first_masked < total_blocks

    if total_blocks == nb:
        in_map = lambda c, i: (c * steps + i, 0)
    else:
        # One phantom block when nb is odd: clamp its DMA onto the last real
        # block; the in-kernel row mask zeroes its contribution.
        in_map = lambda c, i: (jnp.minimum(c * steps + i, nb - 1), 0)

    in_spec = pl.BlockSpec((t, LANES), in_map)
    out = pl.pallas_call(
        _make_kernel(t, chunk, steps, rows, first_masked, needs_mask),
        out_shape=jax.ShapeDtypeStruct((num_cores, 8, LANES), jnp.float32),
        grid=(num_cores, steps),
        in_specs=[in_spec, in_spec],
        out_specs=pl.BlockSpec((None, 8, LANES), lambda c, i: (c, 0, 0)),
        compiler_params=pltpu.CompilerParams(
            dimension_semantics=("parallel", "arbitrary"),
            vmem_limit_bytes=32 * 1024 * 1024,
        ),
    )(pred2d, true2d)
    return jnp.sum(out)


def smooth_l1_loss(y_pred, y_true, *, tile_rows=8192):
    """Smooth-L1 (Huber, beta=1.0) loss with mean reduction."""
    assert y_pred.shape == y_true.shape
    n_elem = int(y_pred.size)
    assert n_elem > 0

    flat_p = y_pred.reshape(-1)
    flat_t = y_true.reshape(-1)

    itemsize = min(jnp.dtype(y_pred.dtype).itemsize,
                   jnp.dtype(y_true.dtype).itemsize)
    sub = {4: 8, 2: 16, 1: 32}.get(int(itemsize), 8)

    rows = n_elem // LANES
    if rows >= sub:
        prefix = rows * LANES
        kernel_sum = _pallas_partial_sum(
            flat_p[:prefix].reshape(rows, LANES),
            flat_t[:prefix].reshape(rows, LANES),
            rows, sub, tile_rows)
    else:
        prefix = 0
        kernel_sum = jnp.float32(0.0)

    if prefix < n_elem:
        # Tiny leftover (< 128 elements, or the whole thing for sub-4K inputs):
        # plain jnp, no padded copy of the big arrays.
        tp = flat_p[prefix:].astype(jnp.float32)
        tt = flat_t[prefix:].astype(jnp.float32)
        kernel_sum = kernel_sum + jnp.sum(_huber(jnp.abs(tp - tt)))

    return kernel_sum / n_elem


if __name__ == "__main__":
    key = jax.random.PRNGKey(0)
    k1, k2 = jax.random.split(key)
    shape = (2, 4, 16, 16)
    y_pred = jax.random.normal(k1, shape, dtype=jnp.float32)
    y_true = jax.random.normal(k2, shape, dtype=jnp.float32)

    loss = jax.jit(smooth_l1_loss)(y_pred, y_true)
    jax.block_until_ready(loss)

    # Reference check against plain JAX.
    diff = jnp.abs(y_pred - y_true)
    ref = jnp.mean(jnp.where(diff < 1.0, 0.5 * diff * diff, diff - 0.5))
    assert jnp.allclose(loss, ref, atol=1e-5, rtol=1e-5), (loss, ref)

    print("KERNEL_OK")
</pallas_src>

<mosaic_0001>
module attributes {stable_mosaic.version = 11 : i64} {
  func.func @kernel(%arg0: i32, %arg1: i32, %arg2: memref<16x128xf32, #tpu.memory_space<vmem>>, %arg3: memref<16x128xf32, #tpu.memory_space<vmem>>, %arg4: memref<1x8x128xf32, #tpu.memory_space<vmem>>) attributes {dimension_semantics = [#tpu.dimension_semantics<parallel>, #tpu.dimension_semantics<arbitrary>], iteration_bounds = array<i64: 1, 1>, scalar_prefetch = 0 : i64, scratch_operands = 0 : i64, tpu.core_type = #tpu.core_type<tc>, window_params = [{transform_indices = @transform_0, window_bounds = array<i64: 16, 128>}, {transform_indices = @transform_1, window_bounds = array<i64: 16, 128>}, {transform_indices = @transform_2, window_bounds = array<i64: 1, 8, 128>}]} {
    %c0_i32 = arith.constant 0 : i32
    %0 = arith.cmpi eq, %arg1, %c0_i32 : i32
    %1 = arith.extui %0 : i1 to i32
    %c0_i32_0 = arith.constant 0 : i32
    %2 = arith.cmpi ne, %1, %c0_i32_0 : i32
    scf.if %2 {
      %cst_12 = arith.constant 0.000000e+00 : f32
      %27 = vector.broadcast %cst_12 : f32 to vector<8x128xf32>
      %c0_13 = arith.constant 0 : index
      %c0_14 = arith.constant 0 : index
      %c0_15 = arith.constant 0 : index
      %28 = vector.load %arg4[%c0_13, %c0_14, %c0_15] : memref<1x8x128xf32, #tpu.memory_space<vmem>>, vector<1x8x128xf32>
      %29 = vector.shape_cast %28 : vector<1x8x128xf32> to vector<8x128xf32>
      %30 = vector.shape_cast %27 : vector<8x128xf32> to vector<1x8x128xf32>
      tpu.vector_store %arg4[%c0_13, %c0_14, %c0_15], %30 {strides = array<i32>} : memref<1x8x128xf32, #tpu.memory_space<vmem>>, vector<1x8x128xf32>,
    } else {
    }
    %cst = arith.constant 0.000000e+00 : f32
    %3 = vector.broadcast %cst : f32 to vector<8x128xf32>
    %c0_i32_1 = arith.constant 0 : i32
    %c16_i32 = arith.constant 16 : i32
    %4 = arith.muli %c0_i32_1, %c16_i32 : i32
    %5 = tpu.assume_multiple %4, 16 : i32
    %6 = arith.index_cast %5 : i32 to index
    %c0 = arith.constant 0 : index
    %7 = vector.load %arg2[%6, %c0] : memref<16x128xf32, #tpu.memory_space<vmem>>, vector<16x128xf32>
    %8 = arith.index_cast %5 : i32 to index
    %c0_2 = arith.constant 0 : index
    %9 = vector.load %arg3[%8, %c0_2] : memref<16x128xf32, #tpu.memory_space<vmem>>, vector<16x128xf32>
    %10 = arith.subf %7, %9 : vector<16x128xf32>
    %11 = math.absf %10 : vector<16x128xf32>
    %cst_3 = arith.constant 1.000000e+00 : f32
    %12 = vector.broadcast %cst_3 : f32 to vector<16x128xf32>
    %13 = arith.minimumf %11, %12 : vector<16x128xf32>
    %cst_4 = arith.constant 5.000000e-01 : f32
    %14 = vector.broadcast %cst_4 : f32 to vector<16x128xf32>
    %15 = arith.mulf %14, %13 : vector<16x128xf32>
    %16 = arith.subf %11, %15 : vector<16x128xf32>
    %17 = arith.mulf %13, %16 : vector<16x128xf32>
    %18 = vector.shape_cast %17 : vector<16x128xf32> to vector<2x8x128xf32>
    %cst_5 = arith.constant dense<0.000000e+00> : vector<8x128xf32>
    %19 = vector.multi_reduction <add>, %18, %cst_5 [0] : vector<2x8x128xf32> to vector<8x128xf32>
    %20 = arith.addf %3, %19 : vector<8x128xf32>
    %c1_i32 = arith.constant 1 : i32
    %c0_6 = arith.constant 0 : index
    %c0_7 = arith.constant 0 : index
    %c0_8 = arith.constant 0 : index
    %21 = vector.load %arg4[%c0_6, %c0_7, %c0_8] : memref<1x8x128xf32, #tpu.memory_space<vmem>>, vector<1x8x128xf32>
    %22 = vector.shape_cast %21 : vector<1x8x128xf32> to vector<8x128xf32>
    %23 = arith.addf %22, %20 : vector<8x128xf32>
    %c0_9 = arith.constant 0 : index
    %c0_10 = arith.constant 0 : index
    %c0_11 = arith.constant 0 : index
    %24 = vector.load %arg4[%c0_9, %c0_10, %c0_11] : memref<1x8x128xf32, #tpu.memory_space<vmem>>, vector<1x8x128xf32>
    %25 = vector.shape_cast %24 : vector<1x8x128xf32> to vector<8x128xf32>
    %26 = vector.shape_cast %23 : vector<8x128xf32> to vector<1x8x128xf32>
    tpu.vector_store %arg4[%c0_9, %c0_10, %c0_11], %26 {strides = array<i32>} : memref<1x8x128xf32, #tpu.memory_space<vmem>>, vector<1x8x128xf32>,
    return
  }
  func.func @transform_0(%arg0: i32, %arg1: i32) -> (i32, i32) {
    %c1_i32 = arith.constant 1 : i32
    %0 = arith.muli %arg0, %c1_i32 : i32
    %1 = arith.addi %0, %arg1 : i32
    %c0_i32 = arith.constant 0 : i32
    %c0_i32_0 = arith.constant 0 : i32
    return %1, %c0_i32 : i32, i32
  }
  func.func @transform_1(%arg0: i32, %arg1: i32) -> (i32, i32) {
    %c1_i32 = arith.constant 1 : i32
    %0 = arith.muli %arg0, %c1_i32 : i32
    %1 = arith.addi %0, %arg1 : i32
    %c0_i32 = arith.constant 0 : i32
    %c0_i32_0 = arith.constant 0 : i32
    return %1, %c0_i32 : i32, i32
  }
  func.func @transform_2(%arg0: i32, %arg1: i32) -> (i32, i32, i32) {
    %c0_i32 = arith.constant 0 : i32
    %c0_i32_0 = arith.constant 0 : i32
    %c0_i32_1 = arith.constant 0 : i32
    return %arg0, %c0_i32, %c0_i32_0 : i32, i32, i32
  }
}

</mosaic_0001>

<bundles_post_ra>
// kernel: smooth_l1_loss.1
= control target key start
LH: loop header
LB: loop body
LE: loop exit
PB: predicated region body
PF: predicated region fallthrough
CT: control target
= control target key end

     0   :  { %s128_s0 = inlined_call_operand.vmem [shape: f32[16,128], index: 0, kind: input, shape index: {}]   ;;  %s129_s1 = inlined_call_operand.vmem [shape: f32[16,128], index: 1, kind: input, shape index: {}]   ;;  %s130_s2 = inlined_call_operand.vmem [shape: f32[1,8,128], index: 2, kind: output, shape index: {}]  }
   0x1   :  { %v60_v0 = vld [vmem:[%s128_s0] sm:$0xff]  ;;  %v61_v1 = vld [vmem:[%s128_s0 + $0x8] sm:$0xff] }
   0x2   :  { %v62_v2 = vld [vmem:[%s129_s1] sm:$0xff]  ;;  %v63_v3 = vld [vmem:[%s129_s1 + $0x8] sm:$0xff] }
   0x3   :  { %v64_v4 = vsub.f32 %v60_v0, %v62_v2  ;;  %v65_v5 = vsub.f32 %v61_v1, %v63_v3 }
   0x5   :  { %v66_v6 = vand.u32 2147483647, %v64_v4  ;;  %v67_v7 = vand.u32 2147483647, %v65_v5 }
   0x7   :  { %v68_v8 = vmin.f32 %v66_v6, 1.0  ;;  %v69_v9 = vmin.f32 %v67_v7, 1.0 }
   0x9   :  { %v70_v10 = vmul.f32 0.5, %v68_v8  ;;  %v71_v11 = vmul.f32 0.5, %v69_v9 }
   0xb   :  { %v72_v12 = vsub.f32 %v66_v6, %v70_v10  ;;  %v73_v13 = vsub.f32 %v67_v7, %v71_v11 }
   0xd   :  { %v74_v14 = vmul.f32 %v72_v12, %v68_v8  ;;  %v75_v15 = vmul.f32 %v73_v13, %v69_v9 }
   0xf   :  { %v76_v16 = vadd.f32 %v75_v15, %v74_v14 }
  0x11   :  { %80 = vst [vmem:[%s130_s2] sm:$0xff] %v76_v16 }

</bundles_post_ra>
